<compile_context>
chip_gen: v7x
topology: tpu7x:2x2x1
jax: 0.10.0
libtpu: 0.0.40
codegen_flags: <defaults>
</compile_context>

<pallas_src>
import functools

import jax
import jax.numpy as jnp
from jax.experimental import pallas as pl
from jax.experimental.pallas import tpu as pltpu

# Hyperparameters n1 / n2 are free in the original script; concrete values here.
N1 = 128
N2 = 64
IN_FEATURES = 784        # 1 * 28 * 28 (multiple of 8 -> sublane-aligned, no K pad needed)
OUT_FEATURES = 10

# Lane-aligned padded dims (multiples of 128) for the *small* inner dims only.
N2_PAD = 128             # N2 zero-padded
OUT_PAD = 128            # logits zero-padded -> unmasked lane-dense stores
MAX_BLOCK_B = 1024       # x block f32: 1024*784*4 ~= 3.2 MB (x2 buffers) — well within VMEM


def _mlp_kernel(x_ref, w1_ref, b1_ref, w2_ref, b2_ref, w3_ref, b3_ref, o_ref):
    """relu(relu(relu(x@W1+b1)@W2+b2)@W3+b3); f32 input cast to bf16 in-kernel,
    bf16 MXU matmuls with f32 accumulation, bias + ReLU in f32."""
    x = x_ref[...].astype(jnp.bfloat16)                      # cast in VMEM, not in HBM
    h1 = jnp.dot(x, w1_ref[...], preferred_element_type=jnp.float32)
    h1 = jnp.maximum(h1 + b1_ref[...], 0.0).astype(jnp.bfloat16)
    h2 = jnp.dot(h1, w2_ref[...], preferred_element_type=jnp.float32)
    h2 = jnp.maximum(h2 + b2_ref[...], 0.0).astype(jnp.bfloat16)
    h3 = jnp.dot(h2, w3_ref[...], preferred_element_type=jnp.float32)
    o_ref[...] = jnp.maximum(h3 + b3_ref[...], 0.0).astype(o_ref.dtype)


def prepare_params(params):
    """One-time prep: transpose to (in, out), zero-pad small dims to 128, cast to bf16."""
    bf = jnp.bfloat16
    w1t = params["w1"].T.astype(bf)                                           # (784, N1)
    b1 = params["b1"].reshape(1, N1).astype(jnp.float32)
    w2t = jnp.zeros((N1, N2_PAD), bf).at[:, :N2].set(params["w2"].T.astype(bf))
    b2 = jnp.zeros((1, N2_PAD), jnp.float32).at[:, :N2].set(params["b2"].astype(jnp.float32))
    w3t = jnp.zeros((N2_PAD, OUT_PAD), bf).at[:N2, :OUT_FEATURES].set(params["w3"].T.astype(bf))
    b3 = jnp.zeros((1, OUT_PAD), jnp.float32).at[:, :OUT_FEATURES].set(
        params["b3"].astype(jnp.float32))
    return {"w1t": w1t, "b1": b1, "w2t": w2t, "b2": b2, "w3t": w3t, "b3": b3}


def _num_tensorcores():
    """2 on v7x (megacore sharding of the parallel grid axis), else 1."""
    try:
        kind = jax.devices()[0].device_kind.lower()
        if "v7" in kind:
            return 2
    except Exception:
        pass
    return 1


def _choose_block_b(batch):
    """Pick the batch tile.

    * single-TC chips (v5e/v6e): one big block covering the whole batch when it
      fits — no pipeline-step overhead, maximally sized DMA
    * v7x (2 TCs): target >= 4 grid steps (>= 2 per core) so each core's
      double-buffering has something to prefetch
    * prefer a block that either equals the batch (block == full dim is always
      a legal BlockSpec) or divides it, so no batch-pad copy is needed
    """
    n_tc = _num_tensorcores()
    if n_tc > 1 and batch >= 32:
        blk = min(MAX_BLOCK_B, max(8, batch // (2 * n_tc)))
    else:
        blk = min(MAX_BLOCK_B, batch)
    if blk >= batch:
        return batch                       # single grid step, no padding ever
    blk = max(8, (blk // 8) * 8)
    for cand in range(blk, 7, -8):         # largest multiple-of-8 divisor <= blk
        if batch % cand == 0:
            return cand
    return blk                             # fallback: remainder rows get padded


@functools.partial(jax.jit, static_argnames=("block_b",))
def _forward_impl(x_nchw, prep, block_b):
    B = x_nchw.shape[0]
    # nn.Flatten(): row-major flatten of all dims after batch (contiguous -> no copy).
    x = x_nchw.reshape(B, -1)                                       # (B, 784) f32
    b_pad = ((B + block_b - 1) // block_b) * block_b
    if b_pad != B:                                                  # fallback only
        x = jnp.pad(x, ((0, b_pad - B), (0, 0)))

    grid = (b_pad // block_b,)
    flops = 2 * b_pad * (IN_FEATURES * N1 + N1 * N2_PAD + N2_PAD * OUT_PAD)
    bytes_accessed = (b_pad * IN_FEATURES * 4                       # x f32 in
                      + (IN_FEATURES * N1 + N1 * N2_PAD + N2_PAD * OUT_PAD) * 2
                      + (N1 + N2_PAD + OUT_PAD) * 4
                      + b_pad * OUT_PAD * 2)                        # out bf16

    out = pl.pallas_call(
        _mlp_kernel,
        out_shape=jax.ShapeDtypeStruct((b_pad, OUT_PAD), jnp.bfloat16),
        grid_spec=pltpu.PrefetchScalarGridSpec(
            num_scalar_prefetch=0,
            grid=grid,
            in_specs=[
                # activations: tiled over the batch; last dim == full 784 (legal)
                pl.BlockSpec((block_b, IN_FEATURES), lambda i: (i, 0)),
                # weights / biases: VMEM-resident, same block every grid step
                pl.BlockSpec((IN_FEATURES, N1), lambda i: (0, 0)),
                pl.BlockSpec((1, N1), lambda i: (0, 0)),
                pl.BlockSpec((N1, N2_PAD), lambda i: (0, 0)),
                pl.BlockSpec((1, N2_PAD), lambda i: (0, 0)),
                pl.BlockSpec((N2_PAD, OUT_PAD), lambda i: (0, 0)),
                pl.BlockSpec((1, OUT_PAD), lambda i: (0, 0)),
            ],
            out_specs=pl.BlockSpec((block_b, OUT_PAD), lambda i: (i, 0)),
        ),
        compiler_params=pltpu.CompilerParams(
            dimension_semantics=("parallel",),
            vmem_limit_bytes=32 << 20,
        ),
        cost_estimate=pl.CostEstimate(
            flops=flops, transcendentals=0, bytes_accessed=bytes_accessed),
    )(x, prep["w1t"], prep["b1"], prep["w2t"], prep["b2"], prep["w3t"], prep["b3"])

    # Drop batch padding and the zero-padded logit lanes; hand back f32 logits.
    return out[:B, :OUT_FEATURES].astype(jnp.float32)


def fst_neural_network_forward(x_nchw, prep, block_b=None):
    """Forward pass. x_nchw: (B, 1, 28, 28); prep: output of prepare_params(params)."""
    if block_b is None:
        block_b = _choose_block_b(x_nchw.shape[0])
    return _forward_impl(x_nchw, prep, block_b)


def init_params(key):
    """Init matching nn.Linear default: U(-1/sqrt(fan_in), +1/sqrt(fan_in))."""
    def linear(key, fan_out, fan_in):
        kw, kb = jax.random.split(key)
        bound = 1.0 / (fan_in ** 0.5)
        w = jax.random.uniform(kw, (fan_out, fan_in), jnp.float32, -bound, bound)
        b = jax.random.uniform(kb, (fan_out,), jnp.float32, -bound, bound)
        return w, b

    k1, k2, k3 = jax.random.split(key, 3)
    w1, b1 = linear(k1, N1, IN_FEATURES)
    w2, b2 = linear(k2, N2, N1)
    w3, b3 = linear(k3, OUT_FEATURES, N2)
    return {"w1": w1, "b1": b1, "w2": w2, "b2": b2, "w3": w3, "b3": b3}


def _reference_forward_f32(x_nchw, params):
    """Pure-f32 reference with the original PyTorch semantics."""
    x = x_nchw.reshape(x_nchw.shape[0], -1).astype(jnp.float32)
    h = jnp.maximum(x @ params["w1"].T + params["b1"], 0.0)
    h = jnp.maximum(h @ params["w2"].T + params["b2"], 0.0)
    return jnp.maximum(h @ params["w3"].T + params["b3"], 0.0)


def _reference_forward_bf16(x_nchw, params):
    """Reference following the kernel's bf16-input / f32-accumulate numerics."""
    bf = jnp.bfloat16
    x = x_nchw.reshape(x_nchw.shape[0], -1).astype(bf)
    h = jnp.dot(x, params["w1"].T.astype(bf), preferred_element_type=jnp.float32) + params["b1"]
    h = jnp.maximum(h, 0.0).astype(bf)
    h = jnp.dot(h, params["w2"].T.astype(bf), preferred_element_type=jnp.float32) + params["b2"]
    h = jnp.maximum(h, 0.0).astype(bf)
    h = jnp.dot(h, params["w3"].T.astype(bf), preferred_element_type=jnp.float32) + params["b3"]
    return jnp.maximum(h, 0.0)


if __name__ == "__main__":
    key = jax.random.PRNGKey(0)
    k_params, k_x = jax.random.split(key)

    params = init_params(k_params)
    prep = prepare_params(params)   # one-time transpose/pad/cast

    # Small MNIST-like batch: (B=64, C=1, H=28, W=28) NCHW.
    x = jax.random.normal(k_x, (64, 1, 28, 28), dtype=jnp.float32)

    out = fst_neural_network_forward(x, prep)
    out = jax.block_until_ready(out)
    assert out.shape == (64, OUT_FEATURES)

    # Tight check against a reference that mirrors the kernel's bf16/f32 numerics
    # (output passes through a bf16 store, so compare in bf16 precision).
    ref_bf16 = _reference_forward_bf16(x, params).astype(jnp.bfloat16).astype(jnp.float32)
    assert jnp.allclose(out, ref_bf16, atol=3e-2, rtol=3e-2), "mismatch vs bf16 reference"

    # Loose sanity check against the full-f32 original-module semantics.
    ref_f32 = _reference_forward_f32(x, params)
    assert jnp.allclose(out, ref_f32, atol=0.25, rtol=0.25), "mismatch vs f32 reference"

    print("KERNEL_OK")
</pallas_src>

<mosaic_0001>
module attributes {stable_mosaic.version = 11 : i64} {
  func.func @_mlp_kernel(%arg0: i32, %arg1: memref<64x784xf32, #tpu.memory_space<vmem>>, %arg2: memref<784x128xbf16, #tpu.memory_space<vmem>>, %arg3: memref<1x128xf32, #tpu.memory_space<vmem>>, %arg4: memref<128x128xbf16, #tpu.memory_space<vmem>>, %arg5: memref<1x128xf32, #tpu.memory_space<vmem>>, %arg6: memref<128x128xbf16, #tpu.memory_space<vmem>>, %arg7: memref<1x128xf32, #tpu.memory_space<vmem>>, %arg8: memref<64x128xbf16, #tpu.memory_space<vmem>>) attributes {dimension_semantics = [#tpu.dimension_semantics<parallel>], iteration_bounds = array<i64: 1>, scalar_prefetch = 0 : i64, scratch_operands = 0 : i64, tpu.core_type = #tpu.core_type<tc>, window_params = [{transform_indices = @transform_0, window_bounds = array<i64: 64, 784>}, {pipeline_mode = #tpu.pipeline_mode<synchronous>, transform_indices = @transform_1, window_bounds = array<i64: 784, 128>}, {pipeline_mode = #tpu.pipeline_mode<synchronous>, transform_indices = @transform_2, window_bounds = array<i64: 1, 128>}, {pipeline_mode = #tpu.pipeline_mode<synchronous>, transform_indices = @transform_3, window_bounds = array<i64: 128, 128>}, {pipeline_mode = #tpu.pipeline_mode<synchronous>, transform_indices = @transform_4, window_bounds = array<i64: 1, 128>}, {pipeline_mode = #tpu.pipeline_mode<synchronous>, transform_indices = @transform_5, window_bounds = array<i64: 128, 128>}, {pipeline_mode = #tpu.pipeline_mode<synchronous>, transform_indices = @transform_6, window_bounds = array<i64: 1, 128>}, {transform_indices = @transform_7, window_bounds = array<i64: 64, 128>}]} {
    %c0 = arith.constant 0 : index
    %c0_0 = arith.constant 0 : index
    %0 = vector.load %arg1[%c0, %c0_0] : memref<64x784xf32, #tpu.memory_space<vmem>>, vector<64x784xf32>
    %1 = arith.truncf %0 : vector<64x784xf32> to vector<64x784xbf16>
    %c0_1 = arith.constant 0 : index
    %c0_2 = arith.constant 0 : index
    %2 = vector.load %arg2[%c0_1, %c0_2] : memref<784x128xbf16, #tpu.memory_space<vmem>>, vector<784x128xbf16>
    %cst = arith.constant dense<0.000000e+00> : vector<64x128xf32>
    %3 = tpu.matmul %1, %2, %cst {dimension_numbers = #tpu.dot_dimension_numbers<[1], [0], [0], [1], [0, 0, 1, 1], [], []>} : vector<64x784xbf16>, vector<784x128xbf16>, vector<64x128xf32> -> vector<64x128xf32>
    %c0_3 = arith.constant 0 : index
    %c0_4 = arith.constant 0 : index
    %4 = vector.load %arg3[%c0_3, %c0_4] : memref<1x128xf32, #tpu.memory_space<vmem>>, vector<1x128xf32>
    %5 = vector.broadcast %4 : vector<1x128xf32> to vector<64x128xf32>
    %6 = arith.addf %3, %5 : vector<64x128xf32>
    %cst_5 = arith.constant 0.000000e+00 : f32
    %7 = vector.broadcast %cst_5 : f32 to vector<64x128xf32>
    %8 = arith.maximumf %6, %7 : vector<64x128xf32>
    %9 = arith.truncf %8 : vector<64x128xf32> to vector<64x128xbf16>
    %c0_6 = arith.constant 0 : index
    %c0_7 = arith.constant 0 : index
    %10 = vector.load %arg4[%c0_6, %c0_7] : memref<128x128xbf16, #tpu.memory_space<vmem>>, vector<128x128xbf16>
    %cst_8 = arith.constant dense<0.000000e+00> : vector<64x128xf32>
    %11 = tpu.matmul %9, %10, %cst_8 {dimension_numbers = #tpu.dot_dimension_numbers<[1], [0], [0], [1], [0, 0, 1, 1], [], []>} : vector<64x128xbf16>, vector<128x128xbf16>, vector<64x128xf32> -> vector<64x128xf32>
    %c0_9 = arith.constant 0 : index
    %c0_10 = arith.constant 0 : index
    %12 = vector.load %arg5[%c0_9, %c0_10] : memref<1x128xf32, #tpu.memory_space<vmem>>, vector<1x128xf32>
    %13 = vector.broadcast %12 : vector<1x128xf32> to vector<64x128xf32>
    %14 = arith.addf %11, %13 : vector<64x128xf32>
    %cst_11 = arith.constant 0.000000e+00 : f32
    %15 = vector.broadcast %cst_11 : f32 to vector<64x128xf32>
    %16 = arith.maximumf %14, %15 : vector<64x128xf32>
    %17 = arith.truncf %16 : vector<64x128xf32> to vector<64x128xbf16>
    %c0_12 = arith.constant 0 : index
    %c0_13 = arith.constant 0 : index
    %18 = vector.load %arg6[%c0_12, %c0_13] : memref<128x128xbf16, #tpu.memory_space<vmem>>, vector<128x128xbf16>
    %cst_14 = arith.constant dense<0.000000e+00> : vector<64x128xf32>
    %19 = tpu.matmul %17, %18, %cst_14 {dimension_numbers = #tpu.dot_dimension_numbers<[1], [0], [0], [1], [0, 0, 1, 1], [], []>} : vector<64x128xbf16>, vector<128x128xbf16>, vector<64x128xf32> -> vector<64x128xf32>
    %c0_15 = arith.constant 0 : index
    %c0_16 = arith.constant 0 : index
    %20 = vector.load %arg7[%c0_15, %c0_16] : memref<1x128xf32, #tpu.memory_space<vmem>>, vector<1x128xf32>
    %21 = vector.broadcast %20 : vector<1x128xf32> to vector<64x128xf32>
    %22 = arith.addf %19, %21 : vector<64x128xf32>
    %cst_17 = arith.constant 0.000000e+00 : f32
    %23 = vector.broadcast %cst_17 : f32 to vector<64x128xf32>
    %24 = arith.maximumf %22, %23 : vector<64x128xf32>
    %25 = arith.truncf %24 : vector<64x128xf32> to vector<64x128xbf16>
    %c0_18 = arith.constant 0 : index
    %c0_19 = arith.constant 0 : index
    %26 = vector.load %arg8[%c0_18, %c0_19] : memref<64x128xbf16, #tpu.memory_space<vmem>>, vector<64x128xbf16>
    tpu.vector_store %arg8[%c0_18, %c0_19], %25 {strides = array<i32>} : memref<64x128xbf16, #tpu.memory_space<vmem>>, vector<64x128xbf16>,
    return
  }
  func.func @transform_0(%arg0: i32) -> (i32, i32) {
    %c0_i32 = arith.constant 0 : i32
    %c0_i32_0 = arith.constant 0 : i32
    return %arg0, %c0_i32 : i32, i32
  }
  func.func @transform_1(%arg0: i32) -> (i32, i32) {
    %c0_i32 = arith.constant 0 : i32
    %c0_i32_0 = arith.constant 0 : i32
    %c0_i32_1 = arith.constant 0 : i32
    return %c0_i32, %c0_i32_0 : i32, i32
  }
  func.func @transform_2(%arg0: i32) -> (i32, i32) {
    %c0_i32 = arith.constant 0 : i32
    %c0_i32_0 = arith.constant 0 : i32
    %c0_i32_1 = arith.constant 0 : i32
    return %c0_i32, %c0_i32_0 : i32, i32
  }
  func.func @transform_3(%arg0: i32) -> (i32, i32) {
    %c0_i32 = arith.constant 0 : i32
    %c0_i32_0 = arith.constant 0 : i32
    %c0_i32_1 = arith.constant 0 : i32
    return %c0_i32, %c0_i32_0 : i32, i32
  }
  func.func @transform_4(%arg0: i32) -> (i32, i32) {
    %c0_i32 = arith.constant 0 : i32
    %c0_i32_0 = arith.constant 0 : i32
    %c0_i32_1 = arith.constant 0 : i32
    return %c0_i32, %c0_i32_0 : i32, i32
  }
  func.func @transform_5(%arg0: i32) -> (i32, i32) {
    %c0_i32 = arith.constant 0 : i32
    %c0_i32_0 = arith.constant 0 : i32
    %c0_i32_1 = arith.constant 0 : i32
    return %c0_i32, %c0_i32_0 : i32, i32
  }
  func.func @transform_6(%arg0: i32) -> (i32, i32) {
    %c0_i32 = arith.constant 0 : i32
    %c0_i32_0 = arith.constant 0 : i32
    %c0_i32_1 = arith.constant 0 : i32
    return %c0_i32, %c0_i32_0 : i32, i32
  }
  func.func @transform_7(%arg0: i32) -> (i32, i32) {
    %c0_i32 = arith.constant 0 : i32
    %c0_i32_0 = arith.constant 0 : i32
    return %arg0, %c0_i32 : i32, i32
  }
}

</mosaic_0001>

<bundles_post_ra>
// kernel: _forward_impl.1
= control target key start
LH: loop header
LB: loop body
LE: loop exit
PB: predicated region body
PF: predicated region fallthrough
CT: control target
= control target key end

     0   :  { %vm510_vm0 = vcmask 130048   ;;  %s1942_s1 = inlined_call_operand.vmem [shape: bf16[784,128], index: 1, kind: input, shape index: {}]   ;;  %s1943_s0 = inlined_call_operand.vmem [shape: f32[64,784], index: 0, kind: input, shape index: {}]   ;;  %s1944_s3 = inlined_call_operand.vmem [shape: bf16[128,128], index: 3, kind: input, shape index: {}]   ;;  %s1945_s5 = inlined_call_operand.vmem [shape: bf16[128,128], index: 5, kind: input, shape index: {}]   ;;  %s1946_s2 = inlined_call_operand.vmem [shape: f32[1,128], index: 2, kind: input, shape index: {}]   ;;  %s1947_s4 = inlined_call_operand.vmem [shape: f32[1,128], index: 4, kind: input, shape index: {}]   ;;  %s1948_s6 = inlined_call_operand.vmem [shape: f32[1,128], index: 6, kind: input, shape index: {}]   ;;  %s1949_s7 = inlined_call_operand.vmem [shape: bf16[64,128], index: 7, kind: output, shape index: {}]  }
   0x1   :  { %v1449_v0 = vld [vmem:[%s1942_s1 + $0x40] sm:$0xff]   ;;  %v1453_v4 = vld [vmem:[%s1942_s1 + $0x48] sm:$0xff]   ;;  %v1457_v8 = vld [vmem:[%s1942_s1 + $0x50] sm:$0xff]  }
   0x2   :  { %v1450_v1 = vld [vmem:[%s1942_s1] sm:$0xff]   ;;  %1242 = vmatprep.subr.bf16.mxu0 %v1449_v0  ;;  %v1454_v5 = vld [vmem:[%s1942_s1 + $0x8] sm:$0xff]   ;;  %v1458_v9 = vld [vmem:[%s1942_s1 + $0x10] sm:$0xff]  }
   0x3   :  { %v1451_v2 = vld [vmem:[%s1942_s1 + $0xc0] sm:$0xff]   ;;  %1243 = vmatpush3.bf16.msra.mxu0 %v1450_v1  ;;  %v1455_v6 = vld [vmem:[%s1942_s1 + $0xc8] sm:$0xff]   ;;  %v1459_v10 = vld [vmem:[%s1942_s1 + $0xd0] sm:$0xff]  }
   0x4   :  { %v1452_v3 = vld [vmem:[%s1942_s1 + $0x80] sm:$0xff]   ;;  %1282 = vmatprep.subr.bf16.mxu1 %v1451_v2  ;;  %1244 = vmatprep.subr.bf16.mxu0 %v1453_v4  ;;  %v1456_v7 = vld [vmem:[%s1942_s1 + $0x88] sm:$0xff]   ;;  %v1460_v11 = vld [vmem:[%s1942_s1 + $0x90] sm:$0xff]  }
   0x5   :  { %1283 = vmatpush3.bf16.msra.mxu1 %v1452_v3  ;;  %v1461_v12 = vld [vmem:[%s1942_s1 + $0x58] sm:$0xff]   ;;  %v1465_v16 = vld [vmem:[%s1942_s1 + $0x60] sm:$0xff]   ;;  %v1469_v20 = vld [vmem:[%s1942_s1 + $0x68] sm:$0xff]  }
   0x6   :  { %1284 = vmatprep.subr.bf16.mxu1 %v1455_v6  ;;  %v1462_v13 = vld [vmem:[%s1942_s1 + $0x18] sm:$0xff]   ;;  %v1466_v17 = vld [vmem:[%s1942_s1 + $0x20] sm:$0xff]   ;;  %v1470_v21 = vld [vmem:[%s1942_s1 + $0x28] sm:$0xff]  }
   0x7   :  { %1245 = vmatpush3.bf16.msra.mxu0 %v1454_v5  ;;  %v1463_v14 = vld [vmem:[%s1942_s1 + $0xd8] sm:$0xff]   ;;  %v1467_v18 = vld [vmem:[%s1942_s1 + $0xe0] sm:$0xff]   ;;  %v1471_v22 = vld [vmem:[%s1942_s1 + $0xe8] sm:$0xff]  }
   0x8   :  { %1246 = vmatprep.subr.bf16.mxu0 %v1457_v8  ;;  %v1464_v15 = vld [vmem:[%s1942_s1 + $0x98] sm:$0xff]   ;;  %v1468_v19 = vld [vmem:[%s1942_s1 + $0xa0] sm:$0xff]   ;;  %v1472_v23 = vld [vmem:[%s1942_s1 + $0xa8] sm:$0xff]  }
   0x9   :  { %1285 = vmatpush3.bf16.msra.mxu1 %v1456_v7  ;;  %v1473_v24 = vld [vmem:[%s1942_s1 + $0x70] sm:$0xff]   ;;  %v1477_v28 = vld [vmem:[%s1942_s1 + $0x78] sm:$0xff]   ;;  %v28_v31 = vld [vmem:[%s1943_s0 + $0x8] sm:$0xff] }
   0xa   :  { %1286 = vmatprep.subr.bf16.mxu1 %v1459_v10  ;;  %v1474_v25 = vld [vmem:[%s1942_s1 + $0x30] sm:$0xff]   ;;  %v1478_v29 = vld [vmem:[%s1942_s1 + $0x38] sm:$0xff]   ;;  %v35_v32 = vld [vmem:[%s1943_s0 + $0x40] sm:$0xff] }
   0xb   :  { %1247 = vmatpush3.bf16.msra.mxu0 %v1458_v9  ;;  %v1475_v26 = vld [vmem:[%s1942_s1 + $0xf0] sm:$0xff]   ;;  %v1479_v30 = vld [vmem:[%s1942_s1 + $0xf8] sm:$0xff]   ;;  %v84_v33 = vpack.c.bf16 %v35_v32, %v28_v31  ;;  %v27_v35 = vld [vmem:[%s1943_s0] sm:$0xff] }
   0xc   :  { %1248 = vmatprep.subr.bf16.mxu0 %v1461_v12  ;;  %v1476_v27 = vld [vmem:[%s1942_s1 + $0xb0] sm:$0xff]   ;;  %v1480_v34 = vld [vmem:[%s1942_s1 + $0xb8] sm:$0xff]   ;;  %v1481_v38 = vld [vmem:[%s1942_s1 + $0x140] sm:$0xff]  }
   0xd   :  { %1287 = vmatpush3.bf16.msra.mxu1 %v1460_v11  ;;  %v34_v36 = vld [vmem:[%s1943_s0 + $0x38] sm:$0xff]  ;;  %555 = vmatprep.mubr.bf16.mxu0 %v84_v33  ;;  %v37_v40 = vld [vmem:[%s1943_s0 + $0x50] sm:$0xff]  ;;  %v1482_v42 = vld [vmem:[%s1942_s1 + $0x100] sm:$0xff]  }
   0xe   :  { %1288 = vmatprep.subr.bf16.mxu1 %v1463_v14  ;;  %v83_v37 = vpack.c.bf16 %v34_v36, %v27_v35  ;;  %v30_v39 = vld [vmem:[%s1943_s0 + $0x18] sm:$0xff]  ;;  %v29_v43 = vld [vmem:[%s1943_s0 + $0x10] sm:$0xff]  ;;  %v36_v44 = vld [vmem:[%s1943_s0 + $0x48] sm:$0xff] }
   0xf   :  { %1249 = vmatpush3.bf16.msra.mxu0 %v1462_v13  ;;  %v86_v41 = vpack.c.bf16 %v37_v40, %v30_v39  ;;  %v85_v45 = vpack.c.bf16 %v36_v44, %v29_v43  ;;  %v1483_v46 = vld [vmem:[%s1942_s1 + $0x148] sm:$0xff]   ;;  %v42_v48 = vld [vmem:[%s1943_s0 + $0x78] sm:$0xff]  ;;  %v49_v49 = vld [vmem:[%s1943_s0 + $0xb0] sm:$0xff] }
  0x10   :  { %1250 = vmatprep.subr.bf16.mxu0 %v1465_v16  ;;  %v1484_v47 = vld [vmem:[%s1942_s1 + $0x108] sm:$0xff]   ;;  %v41_v50 = vld [vmem:[%s1943_s0 + $0x70] sm:$0xff]  ;;  %v91_v52 = vpack.c.bf16 %v49_v49, %v42_v48  ;;  %v51_v56 = vld [vmem:[%s1943_s0 + $0xc0] sm:$0xff] }
  0x11   :  { %1289 = vmatpush3.bf16.msra.mxu1 %v1464_v15  ;;  %620 = vmatprep.mubr.bf16.mxu1 %v86_v41  ;;  %v48_v51 = vld [vmem:[%s1943_s0 + $0xa8] sm:$0xff]  ;;  %v1485_v54 = vld [vmem:[%s1942_s1 + $0x150] sm:$0xff]   ;;  %v43_v59 = vld [vmem:[%s1943_s0 + $0x80] sm:$0xff] }
  0x12   :  { %1290 = vmatprep.subr.bf16.mxu1 %v1467_v18  ;;  %v90_v53 = vpack.c.bf16 %v48_v51, %v41_v50  ;;  %v44_v55 = vld [vmem:[%s1943_s0 + $0x88] sm:$0xff]  ;;  %v1486_v58 = vld [vmem:[%s1942_s1 + $0x110] sm:$0xff]   ;;  %v50_v60 = vld [vmem:[%s1943_s0 + $0xb8] sm:$0xff] }
  0x13   :  { %1251 = vmatpush3.bf16.msra.mxu0 %v1466_v17  ;;  %v93_v57 = vpack.c.bf16 %v51_v56, %v44_v55  ;;  %v92_v61 = vpack.c.bf16 %v50_v60, %v43_v59  ;;  %v1487_v62 = vld [vmem:[%s1942_s1 + $0x158] sm:$0xff]   ;;  %v56_v0 = vld [vmem:[%s1943_s0 + $0xe8] sm:$0xff]  ;;  %v63_v1 = vld [vmem:[%s1943_s0 + $0x120] sm:$0xff] }
  0x14   :  { %1252 = vmatprep.subr.bf16.mxu0 %v1469_v20  ;;  %v1488_v63 = vld [vmem:[%s1942_s1 + $0x118] sm:$0xff]   ;;  %v98_v2 = vpack.c.bf16 %v63_v1, %v56_v0  ;;  %v55_v3 = vld [vmem:[%s1943_s0 + $0xe0] sm:$0xff]  ;;  %v65_v8 = vld [vmem:[%s1943_s0 + $0x130] sm:$0xff] }
  0x15   :  { %1291 = vmatpush3.bf16.msra.mxu1 %v1468_v19  ;;  %v62_v4 = vld [vmem:[%s1943_s0 + $0x118] sm:$0xff]  ;;  %v1489_v5 = vld [vmem:[%s1942_s1 + $0x160] sm:$0xff]   ;;  %v57_v11 = vld [vmem:[%s1943_s0 + $0xf0] sm:$0xff] }
  0x16   :  { %1292 = vmatprep.subr.bf16.mxu1 %v1471_v22  ;;  %v58_v6 = vld [vmem:[%s1943_s0 + $0xf8] sm:$0xff]  ;;  %v97_v7 = vpack.c.bf16 %v62_v4, %v55_v3  ;;  %v1490_v10 = vld [vmem:[%s1942_s1 + $0x120] sm:$0xff]   ;;  %v64_v12 = vld [vmem:[%s1943_s0 + $0x128] sm:$0xff] }
  0x17   :  { %1253 = vmatpush3.bf16.msra.mxu0 %v1470_v21  ;;  %v100_v9 = vpack.c.bf16 %v65_v8, %v58_v6  ;;  %v1491_v13 = vld [vmem:[%s1942_s1 + $0x180] sm:$0xff]   ;;  %v99_v14 = vpack.c.bf16 %v64_v12, %v57_v11  ;;  %v1492_v15 = vld [vmem:[%s1942_s1 + $0x168] sm:$0xff]   ;;  %v70_v17 = vld [vmem:[%s1943_s0 + $0x158] sm:$0xff] }
  0x18   :  { %1254 = vmatprep.subr.bf16.mxu0 %v1473_v24  ;;  %v1493_v16 = vld [vmem:[%s1942_s1 + $0x128] sm:$0xff]   ;;  %v77_v18 = vld [vmem:[%s1943_s0 + $0x190] sm:$0xff]  ;;  %v79_v24 = vld [vmem:[%s1943_s0 + $0x1a0] sm:$0xff] }
  0x19   :  { %1293 = vmatpush3.bf16.msra.mxu1 %v1472_v23  ;;  %v69_v19 = vld [vmem:[%s1943_s0 + $0x150] sm:$0xff]  ;;  %v105_v20 = vpack.c.bf16 %v77_v18, %v70_v17  ;;  %v76_v21 = vld [vmem:[%s1943_s0 + $0x188] sm:$0xff]  ;;  %v1497_v33 = vld [vmem:[%s1942_s1 + $0x138] sm:$0xff]  }
  0x1a   :  { %1294 = vmatprep.subr.bf16.mxu1 %v1475_v26  ;;  %v1494_v22 = vld [vmem:[%s1942_s1 + $0x170] sm:$0xff]   ;;  %v72_v23 = vld [vmem:[%s1943_s0 + $0x168] sm:$0xff]  ;;  %v31_v35 = vld [vmem:[%s1943_s0 + $0x20] sm:$0xff] }
  0x1b   :  { %1255 = vmatpush3.bf16.msra.mxu0 %v1474_v25  ;;  %v104_v25 = vpack.c.bf16 %v76_v21, %v69_v19  ;;  %v107_v26 = vpack.c.bf16 %v79_v24, %v72_v23  ;;  %v32_v32 = vld [vmem:[%s1943_s0 + $0x28] sm:$0xff]  ;;  %v46_v41 = vld [vmem:[%s1943_s0 + $0x98] sm:$0xff]  ;;  %v47_v44 = vld [vmem:[%s1943_s0 + $0xa0] sm:$0xff] }
  0x1c   :  { %1256 = vmatprep.subr.bf16.mxu0 %v1477_v28  ;;  %v71_v28 = vld [vmem:[%s1943_s0 + $0x160] sm:$0xff]  ;;  %v40_v39 = vld [vmem:[%s1943_s0 + $0x68] sm:$0xff]  ;;  %v45_v51 = vld [vmem:[%s1943_s0 + $0x90] sm:$0xff] }
  0x1d   :  { %1295 = vmatpush3.bf16.msra.mxu1 %v1476_v27  ;;  %v1495_v27 = vld [vmem:[%s1942_s1 + $0x130] sm:$0xff]   ;;  %v68_v48 = vld [vmem:[%s1943_s0 + $0x148] sm:$0xff]  ;;  %v75_v56 = vld [vmem:[%s1943_s0 + $0x180] sm:$0xff] }
  0x1e   :  { %1296 = vmatprep.subr.bf16.mxu1 %v1479_v30  ;;  %v1496_v30 = vld [vmem:[%s1942_s1 + $0x178] sm:$0xff]   ;;  %v59_v60 = vld [vmem:[%s1943_s0 + $0x100] sm:$0xff]  ;;  %v80_v3 = vld [vmem:[%s1943_s0 + $0x1a8] sm:$0xff] }
  0x1f   :  { %1257 = vmatpush3.bf16.msra.mxu0 %v1478_v29  ;;  %v78_v29 = vld [vmem:[%s1943_s0 + $0x198] sm:$0xff]  ;;  %v1499_v6 = vld [vmem:[%s1944_s3 + $0x8] sm:$0xff]   ;;  %v1504_v11 = vld [vmem:[%s1944_s3 + $0x30] sm:$0xff]  }
  0x20   :  { %1322 = vmatprep.subr.bf16.mxu0 %v1481_v38  ;;  %v106_v31 = vpack.c.bf16 %v78_v29, %v71_v28  ;;  %v33_v38 = vld [vmem:[%s1943_s0 + $0x30] sm:$0xff]  ;;  %v1501_v8 = vld [vmem:[%s1944_s3 + $0x18] sm:$0xff]   ;;  %v1510_v17 = vld [vmem:[%s1945_s5 + $0x20] sm:$0xff]  }
  0x21   :  { %1297 = vmatpush3.bf16.msra.mxu1 %v1480_v34  ;;  %v39_v34 = vld [vmem:[%s1943_s0 + $0x60] sm:$0xff]  ;;  %v89_v40 = vpack.c.bf16 %v40_v39, %v33_v38  ;;  %v1505_v12 = vld [vmem:[%s1944_s3 + $0x38] sm:$0xff]   ;;  %v1511_v18 = vld [vmem:[%s1945_s5 + $0x28] sm:$0xff]  }
  0x22   :  { %556 = vmatmul.mubr.bf16.vlgmr.msra.gmra.mrb[0].mxu0 %v83_v37  ;;  %1391 = vmatprep.subr.bf16.mxu1 %v1491_v13  ;;  %v88_v36 = vpack.c.bf16 %v39_v34, %v32_v32  ;;  %v38_v37 = vld [vmem:[%s1943_s0 + $0x58] sm:$0xff] }
  0x23   :  { %1323 = vmatpush3.bf16.msra.mxu0 %v1482_v42  ;;  %563 = vmatprep.mubr.bf16.mxu0 %v91_v52  ;;  %v53_v42 = vld [vmem:[%s1943_s0 + $0xd0] sm:$0xff]  ;;  %v87_v43 = vpack.c.bf16 %v38_v37, %v31_v35  ;;  %v52_v52 = vld [vmem:[%s1943_s0 + $0xc8] sm:$0xff] }
  0x24   :  { %621 = vmatmul.mubr.bf16.vlgmr.msra.gmra.mrb[0].mxu1 %v85_v45  ;;  %1324 = vmatprep.subr.bf16.mxu0 %v1483_v46  ;;  %v54_v45 = vld [vmem:[%s1943_s0 + $0xd8] sm:$0xff]  ;;  %v95_v46 = vpack.c.bf16 %v53_v42, %v46_v41  ;;  %v94_v55 = vpack.c.bf16 %v52_v52, %v45_v51 }
  0x25   :  { %628 = vmatprep.mubr.bf16.mxu1 %v93_v57  ;;  %1392 = vmatpush3.bf16.msra.mxu1 %v1491_v13  ;;  %v96_v49 = vpack.c.bf16 %v54_v45, %v47_v44  ;;  %v82_v57 = vld [vmem:[%s1943_s0 + $0x1b8] sm:$0xff]  ;;  %v1506_v13 = vld [vmem:[%s1945_s5] sm:$0xff]  }
  0x26   :  { %v110_v59 = vpack.c.bf16 %v82_v57, %v75_v56  ;;  %1425 = vmatprep.subr.bf16.mxu1 %v1506_v13 }
  0x27   :  { %1325 = vmatpush3.bf16.msra.mxu0 %v1484_v47  ;;  %v61_v47 = vld [vmem:[%s1943_s0 + $0x110] sm:$0xff] }
  0x28   :  { %1326 = vmatprep.subr.bf16.mxu0 %v1485_v54  ;;  %v103_v50 = vpack.c.bf16 %v68_v48, %v61_v47  ;;  %v67_v54 = vld [vmem:[%s1943_s0 + $0x140] sm:$0xff] }
  0x2a   :  { %564 = vmatmul.mubr.bf16.gmra.mrb[4].mxu0 %v90_v53  ;;  %v60_v53 = vld [vmem:[%s1943_s0 + $0x108] sm:$0xff] }
  0x2b   :  { %1327 = vmatpush3.bf16.msra.mxu0 %v1486_v58  ;;  %571 = vmatprep.mubr.bf16.mxu0 %v98_v2  ;;  %v102_v58 = vpack.c.bf16 %v67_v54, %v60_v53  ;;  %v73_v2 = vld [vmem:[%s1943_s0 + $0x170] sm:$0xff] }
  0x2c   :  { %1328 = vmatprep.subr.bf16.mxu0 %v1487_v62  ;;  %629 = vmatmul.mubr.bf16.gmra.mrb[4].mxu1 %v92_v61  ;;  %v66_v61 = vld [vmem:[%s1943_s0 + $0x138] sm:$0xff]  ;;  %v108_v4 = vpack.c.bf16 %v80_v3, %v73_v2 }
  0x2d   :  { %636 = vmatprep.mubr.bf16.mxu1 %v100_v9  ;;  %v74_v62 = vld [vmem:[%s1943_s0 + $0x178] sm:$0xff]  ;;  %v101_v0 = vpack.c.bf16 %v66_v61, %v59_v60  ;;  %v1502_v9 = vld [vmem:[%s1944_s3 + $0x20] sm:$0xff]  }
  0x2f   :  { %1329 = vmatpush3.bf16.msra.mxu0 %v1488_v63  ;;  %v81_v63 = vld [vmem:[%s1943_s0 + $0x1b0] sm:$0xff] }
  0x30   :  { %1330 = vmatprep.subr.bf16.mxu0 %v1489_v5  ;;  %v109_v1 = vpack.c.bf16 %v81_v63, %v74_v62  ;;  %v1498_v5 = vld [vmem:[%s1944_s3] sm:$0xff]  }
  0x32   :  { %572 = vmatmul.mubr.bf16.gmra.mrb[8].mxu0 %v97_v7  ;;  %v1500_v7 = vld [vmem:[%s1944_s3 + $0x10] sm:$0xff]  }
  0x33   :  { %1331 = vmatpush3.bf16.msra.mxu0 %v1490_v10  ;;  %579 = vmatprep.mubr.bf16.mxu0 %v105_v20  ;;  %v1503_v10 = vld [vmem:[%s1944_s3 + $0x28] sm:$0xff]   ;;  %v1131_v20 = vld [vmem:[%s1946_s2] ss:$0 sm:$0xff] }
  0x34   :  { %1332 = vmatprep.subr.bf16.mxu0 %v1492_v15  ;;  %637 = vmatmul.mubr.bf16.gmra.mrb[8].mxu1 %v99_v14  ;;  %v1507_v14 = vld [vmem:[%s1945_s5 + $0x8] sm:$0xff]   ;;  %v1508_v15 = vld [vmem:[%s1945_s5 + $0x10] sm:$0xff]  }
  0x35   :  { %644 = vmatprep.mubr.bf16.mxu1 %v107_v26 }
  0x37   :  { %1333 = vmatpush3.bf16.msra.mxu0 %v1493_v16  ;;  %v1509_v16 = vld [vmem:[%s1945_s5 + $0x18] sm:$0xff]  }
  0x38   :  { %1334 = vmatprep.subr.bf16.mxu0 %v1494_v22 }
  0x3a   :  { %580 = vmatmul.mubr.bf16.gmra.mrb[12].mxu0 %v104_v25 }
  0x3b   :  { %1335 = vmatpush3.bf16.msra.mxu0 %v1495_v27  ;;  %685 = vmatprep.mubr.bf16.mxu0 %v88_v36 }
  0x3c   :  { %1336 = vmatprep.subr.bf16.mxu0 %v1496_v30  ;;  %645 = vmatmul.mubr.bf16.gmra.mrb[12].mxu1 %v106_v31 }
  0x3d   :  { %1393 = vmatprep.mubr.msk.bf16.mxu1 %vm510_vm0, %v89_v40 }
  0x3f   :  { %1337 = vmatpush3.bf16.msra.mxu0 %v1497_v33 }
  0x40   :  { %1401 = vmatprep.subr.bf16.mxu0 %v1498_v5 }
  0x42   :  { %686 = vmatmul.mubr.bf16.vlgmr.msra.gmra.mrb[16].mxu0 %v87_v43 }
  0x43   :  { %693 = vmatprep.mubr.bf16.mxu0 %v95_v46  ;;  %1402 = vmatpush3.bf16.msra.mxu0 %v1498_v5 }
  0x44   :  { %1394 = vmatmul.mubr.msk.bf16.vlgmr.msra.gmra.mrb[16].mxu1 %vm510_vm0, %v96_v49  ;;  %1403 = vmatprep.subr.bf16.mxu0 %v1499_v6 }
  0x45   :  { %1397 = vmatprep.mubr.msk.bf16.mxu1 %vm510_vm0, %v103_v50  ;;  %1426 = vmatpush3.bf16.msra.mxu1 %v1506_v13 }
  0x46   :  { %1427 = vmatprep.subr.bf16.mxu1 %v1507_v14 }
  0x47   :  { %1404 = vmatpush3.bf16.msra.mxu0 %v1499_v6 }
  0x48   :  { %1405 = vmatprep.subr.bf16.mxu0 %v1500_v7 }
  0x49   :  { %1428 = vmatpush3.bf16.msra.mxu1 %v1507_v14 }
  0x4a   :  { %694 = vmatmul.mubr.bf16.gmra.mrb[20].mxu0 %v94_v55  ;;  %1429 = vmatprep.subr.bf16.mxu1 %v1508_v15 }
  0x4b   :  { %701 = vmatprep.mubr.bf16.mxu0 %v102_v58  ;;  %1406 = vmatpush3.bf16.msra.mxu0 %v1500_v7 }
  0x4c   :  { %1398 = vmatmul.mubr.msk.bf16.gmra.mrb[20].mxu1 %vm510_vm0, %v110_v59  ;;  %1407 = vmatprep.subr.bf16.mxu0 %v1501_v8 }
  0x4d   :  { %1430 = vmatpush3.bf16.msra.mxu1 %v1508_v15 }
  0x4e   :  { %1431 = vmatprep.subr.bf16.mxu1 %v1509_v16 }
  0x4f   :  { %1408 = vmatpush3.bf16.msra.mxu0 %v1501_v8 }
  0x50   :  { %1409 = vmatprep.subr.bf16.mxu0 %v1502_v9 }
  0x51   :  { %1432 = vmatpush3.bf16.msra.mxu1 %v1509_v16 }
  0x52   :  { %702 = vmatmul.mubr.bf16.gmra.mrb[24].mxu0 %v101_v0  ;;  %1433 = vmatprep.subr.bf16.mxu1 %v1510_v17 }
  0x53   :  { %709 = vmatprep.mubr.bf16.mxu0 %v109_v1  ;;  %1410 = vmatpush3.bf16.msra.mxu0 %v1502_v9 }
  0x54   :  { %1411 = vmatprep.subr.bf16.mxu0 %v1503_v10 }
  0x55   :  { %1434 = vmatpush3.bf16.msra.mxu1 %v1510_v17 }
  0x56   :  { %1435 = vmatprep.subr.bf16.mxu1 %v1511_v18 }
  0x57   :  { %1412 = vmatpush3.bf16.msra.mxu0 %v1503_v10 }
  0x58   :  { %1413 = vmatprep.subr.bf16.mxu0 %v1504_v11 }
  0x59   :  { %1436 = vmatpush3.bf16.msra.mxu1 %v1511_v18 }
  0x5a   :  { %710 = vmatmul.mubr.bf16.gmra.mrb[28].mxu0 %v108_v4 }
  0x5b   :  { %1414 = vmatpush3.bf16.msra.mxu0 %v1504_v11 }
  0x5c   :  { %1415 = vmatprep.subr.bf16.mxu0 %v1505_v12 }
  0x5f   :  { %1416 = vmatpush3.bf16.msra.mxu0 %v1505_v12 }
  0xf5   :  { %v1258_v19 = vpop.f32.mrb[0].mxu0 }
  0xf6   :  { %v1259_v21 = vpop.f32.mrb[1].mxu0 }
  0xf7   :  { %v1260_v22 = vadd.f32 %v1259_v21, %v1258_v19  ;;  %v1261_v23 = vpop.f32.mrb[2].mxu0  ;;  %v1298_v24 = vpop.f32.mrb[0].mxu1 }
  0xf8   :  { %v1262_v25 = vpop.f32.mrb[3].mxu0  ;;  %v1299_v28 = vpop.f32.mrb[1].mxu1 }
  0xf9   :  { %v558_v26 = vadd.f32 %v1260_v22, %v1131_v20  ;;  %v1263_v27 = vadd.f32 %v1262_v25, %v1261_v23  ;;  %v1300_v29 = vadd.f32 %v1299_v28, %v1298_v24  ;;  %v1301_v30 = vpop.f32.mrb[2].mxu1 }
  0xfa   :  { %v1302_v32 = vpop.f32.mrb[3].mxu1 }
  0xfb   :  { %v561_v31 = vadd.f32 %v1263_v27, %v1131_v20  ;;  %v623_v33 = vadd.f32 %v1300_v29, %v558_v26  ;;  %v1303_v34 = vadd.f32 %v1302_v32, %v1301_v30 }
  0xfd   :  { %v1264_v35 = vpop.f32.mrb[4].mxu0  ;;  %v626_v36 = vadd.f32 %v1303_v34, %v561_v31 }
  0xfe   :  { %v1265_v37 = vpop.f32.mrb[5].mxu0 }
  0xff   :  { %v1266_v38 = vadd.f32 %v1265_v37, %v1264_v35  ;;  %v1267_v39 = vpop.f32.mrb[6].mxu0  ;;  %v1304_v40 = vpop.f32.mrb[4].mxu1 }
 0x100   :  { %v1268_v41 = vpop.f32.mrb[7].mxu0  ;;  %v1305_v44 = vpop.f32.mrb[5].mxu1 }
 0x101   :  { %v566_v42 = vadd.f32 %v1266_v38, %v1131_v20  ;;  %v1269_v43 = vadd.f32 %v1268_v41, %v1267_v39  ;;  %v1306_v45 = vadd.f32 %v1305_v44, %v1304_v40  ;;  %v1307_v46 = vpop.f32.mrb[6].mxu1 }
 0x102   :  { %v1308_v48 = vpop.f32.mrb[7].mxu1 }
 0x103   :  { %v569_v47 = vadd.f32 %v1269_v43, %v1131_v20  ;;  %v631_v49 = vadd.f32 %v1306_v45, %v566_v42  ;;  %v1309_v50 = vadd.f32 %v1308_v48, %v1307_v46 }
 0x105   :  { %v1270_v51 = vpop.f32.mrb[8].mxu0  ;;  %v634_v52 = vadd.f32 %v1309_v50, %v569_v47 }
 0x106   :  { %v1271_v53 = vpop.f32.mrb[9].mxu0 }
 0x107   :  { %v1272_v54 = vadd.f32 %v1271_v53, %v1270_v51  ;;  %v1273_v55 = vpop.f32.mrb[10].mxu0  ;;  %v1310_v56 = vpop.f32.mrb[8].mxu1 }
 0x108   :  { %v1274_v57 = vpop.f32.mrb[11].mxu0  ;;  %v1311_v60 = vpop.f32.mrb[9].mxu1 }
 0x109   :  { %v574_v58 = vadd.f32 %v1272_v54, %v1131_v20  ;;  %v1275_v59 = vadd.f32 %v1274_v57, %v1273_v55  ;;  %v1312_v61 = vadd.f32 %v1311_v60, %v1310_v56  ;;  %v1313_v62 = vpop.f32.mrb[10].mxu1 }
 0x10a   :  { %v1314_v0 = vpop.f32.mrb[11].mxu1 }
 0x10b   :  { %v577_v63 = vadd.f32 %v1275_v59, %v1131_v20  ;;  %v639_v1 = vadd.f32 %v1312_v61, %v574_v58  ;;  %v1315_v2 = vadd.f32 %v1314_v0, %v1313_v62 }
 0x10d   :  { %v1276_v3 = vpop.f32.mrb[12].mxu0  ;;  %v642_v4 = vadd.f32 %v1315_v2, %v577_v63 }
 0x10e   :  { %v1277_v5 = vpop.f32.mrb[13].mxu0 }
 0x10f   :  { %v1278_v6 = vadd.f32 %v1277_v5, %v1276_v3  ;;  %v1279_v7 = vpop.f32.mrb[14].mxu0  ;;  %v1316_v8 = vpop.f32.mrb[12].mxu1 }
 0x110   :  { %v1280_v9 = vpop.f32.mrb[15].mxu0  ;;  %v1317_v12 = vpop.f32.mrb[13].mxu1 }
 0x111   :  { %v582_v10 = vadd.f32 %v1278_v6, %v1131_v20  ;;  %v1281_v11 = vadd.f32 %v1280_v9, %v1279_v7  ;;  %v1318_v13 = vadd.f32 %v1317_v12, %v1316_v8  ;;  %v1319_v14 = vpop.f32.mrb[14].mxu1 }
 0x112   :  { %v1320_v16 = vpop.f32.mrb[15].mxu1 }
 0x113   :  { %v585_v15 = vadd.f32 %v1281_v11, %v1131_v20  ;;  %v647_v17 = vadd.f32 %v1318_v13, %v582_v10  ;;  %v1321_v18 = vadd.f32 %v1320_v16, %v1319_v14 }
 0x115   :  { %v1338_v19 = vpop.f32.mrb[16].mxu0  ;;  %v650_v21 = vadd.f32 %v1321_v18, %v585_v15  ;;  %v1513_v18 = vld [vmem:[%s1945_s5 + $0x38] sm:$0xff]  }
 0x116   :  { %v1339_v22 = vpop.f32.mrb[17].mxu0 }
 0x117   :  { %v1340_v23 = vadd.f32 %v1339_v22, %v1338_v19  ;;  %v1341_v24 = vpop.f32.mrb[18].mxu0  ;;  %v1395_v26 = vpop.f32.mrb[16].mxu1 }
 0x118   :  { %v1342_v25 = vpop.f32.mrb[19].mxu0  ;;  %v752_v29 = vpop.f32.mrb[17].mxu1 }
 0x119   :  { %v1343_v27 = vadd.f32 %v1342_v25, %v1341_v24  ;;  %v688_v28 = vadd.f32 %v1340_v23, %v623_v33  ;;  %v1396_v30 = vpop.f32.mrb[18].mxu1 }
 0x11a   :  { %v755_v34 = vpop.f32.mrb[19].mxu1 }
 0x11b   :  { %v753_v31 = vadd.f32 %v752_v29, %v688_v28  ;;  %v691_v32 = vadd.f32 %v1343_v27, %v626_v36 }
 0x11d   :  { %v756_v35 = vadd.f32 %v755_v34, %v691_v32  ;;  %v1344_v37 = vpop.f32.mrb[20].mxu0  ;;  %v783_v38 = vmax.f32 %v753_v31, 0.0 }
 0x11e   :  { %v1345_v20 = vpop.f32.mrb[21].mxu0 }
 0x11f   :  { %v784_v39 = vmax.f32 %v756_v35, 0.0  ;;  %v1346_v40 = vadd.f32 %v1345_v20, %v1344_v37  ;;  %v1347_v41 = vpop.f32.mrb[22].mxu0  ;;  %v1399_v43 = vpop.f32.mrb[20].mxu1 }
 0x120   :  { %v1348_v42 = vpop.f32.mrb[23].mxu0  ;;  %v768_v47 = vpop.f32.mrb[21].mxu1 }
 0x121   :  { %v791_v44 = vpack.c.bf16 %v784_v39, %v783_v38  ;;  %v696_v45 = vadd.f32 %v1346_v40, %v631_v49  ;;  %v1349_v46 = vadd.f32 %v1348_v42, %v1347_v41  ;;  %v1400_v48 = vpop.f32.mrb[22].mxu1 }
 0x122   :  { %v771_v51 = vpop.f32.mrb[23].mxu1 }
 0x123   :  { %v761_v33 = vadd.f32 %v1395_v26, %v696_v45  ;;  %v699_v50 = vadd.f32 %v1349_v46, %v634_v52  ;;  %1417 = vmatprep.mubr.bf16.mxu0 %v791_v44 }
 0x125   :  { %v764_v36 = vadd.f32 %v1396_v30, %v699_v50  ;;  %v1350_v53 = vpop.f32.mrb[24].mxu0  ;;  %v785_v55 = vmax.f32 %v761_v33, 0.0  ;;  %v1194_v33 = vld [vmem:[%s1948_s6] ss:$0 sm:$0xff] }
 0x126   :  { %v1351_v54 = vpop.f32.mrb[25].mxu0 }
 0x127   :  { %v786_v56 = vmax.f32 %v764_v36, 0.0  ;;  %v1352_v57 = vadd.f32 %v1351_v54, %v1350_v53  ;;  %v1353_v58 = vpop.f32.mrb[26].mxu0 }
 0x128   :  { %v1354_v59 = vpop.f32.mrb[27].mxu0 }
 0x129   :  { %v792_v60 = vpack.c.bf16 %v786_v56, %v785_v55  ;;  %v1355_v61 = vadd.f32 %v1354_v59, %v1353_v58  ;;  %v704_v62 = vadd.f32 %v1352_v57, %v639_v1 }
 0x12b   :  { %v769_v63 = vadd.f32 %v768_v47, %v704_v62  ;;  %1418 = vmatmul.mubr.bf16.vlgmr.msra.gmra.mrb[32].mxu0 %v792_v60  ;;  %v707_v49 = vadd.f32 %v1355_v61, %v642_v4  ;;  %v1512_v4 = vld [vmem:[%s1945_s5 + $0x30] sm:$0xff]  }
 0x12c   :  { %1437 = vmatprep.subr.bf16.mxu1 %v1512_v4 }
 0x12d   :  { %v772_v0 = vadd.f32 %v771_v51, %v707_v49  ;;  %v1356_v2 = vpop.f32.mrb[28].mxu0  ;;  %v787_v52 = vmax.f32 %v769_v63, 0.0  ;;  %1438 = vmatpush3.bf16.msra.mxu1 %v1512_v4 }
 0x12e   :  { %v1357_v3 = vpop.f32.mrb[29].mxu0  ;;  %1439 = vmatprep.subr.bf16.mxu1 %v1513_v18 }
 0x12f   :  { %v788_v5 = vmax.f32 %v772_v0, 0.0  ;;  %v1358_v6 = vadd.f32 %v1357_v3, %v1356_v2  ;;  %v1359_v7 = vpop.f32.mrb[30].mxu0 }
 0x130   :  { %v1360_v8 = vpop.f32.mrb[31].mxu0 }
 0x131   :  { %v793_v9 = vpack.c.bf16 %v788_v5, %v787_v52  ;;  %v712_v10 = vadd.f32 %v1358_v6, %v647_v17  ;;  %v1361_v11 = vadd.f32 %v1360_v8, %v1359_v7  ;;  %1440 = vmatpush3.bf16.msra.mxu1 %v1513_v18  ;;  %v1185_v17 = vld [vmem:[%s1947_s4] ss:$0 sm:$0xff] }
 0x133   :  { %v777_v12 = vadd.f32 %v1399_v43, %v712_v10  ;;  %v715_v13 = vadd.f32 %v1361_v11, %v650_v21  ;;  %1421 = vmatprep.mubr.bf16.mxu0 %v793_v9 }
 0x135   :  { %v780_v14 = vadd.f32 %v1400_v48, %v715_v13  ;;  %v789_v15 = vmax.f32 %v777_v12, 0.0 }
 0x137   :  { %v790_v1 = vmax.f32 %v780_v14, 0.0 }
 0x139   :  { %v794_v16 = vpack.c.bf16 %v790_v1, %v789_v15 }
 0x13b   :  { %1422 = vmatmul.mubr.bf16.gmra.mrb[36].mxu0 %v794_v16 }
 0x1fe   :  { %v1419_v19 = vpop.f32.mrb[32].mxu0 }
 0x1ff   :  { %v909_v21 = vadd.f32 %v1419_v19, %v1185_v17  ;;  %v900_v22 = vpop.f32.mrb[33].mxu0 }
 0x200   :  { %v901_v23 = vadd.f32 %v1185_v17, %v900_v22  ;;  %v1420_v24 = vpop.f32.mrb[34].mxu0 }
 0x201   :  { %v912_v25 = vadd.f32 %v1420_v24, %v1185_v17  ;;  %v903_v26 = vpop.f32.mrb[35].mxu0  ;;  %v933_v28 = vmax.f32 %v909_v21, 0.0 }
 0x202   :  { %v904_v27 = vadd.f32 %v1185_v17, %v903_v26  ;;  %v931_v30 = vmax.f32 %v901_v23, 0.0 }
 0x203   :  { %v934_v29 = vmax.f32 %v912_v25, 0.0 }
 0x204   :  { %v932_v31 = vmax.f32 %v904_v27, 0.0 }
 0x205   :  { %v940_v32 = vpack.c.bf16 %v934_v29, %v933_v28 }
 0x206   :  { %v939_v34 = vpack.c.bf16 %v932_v31, %v931_v30 }
 0x208   :  { %1441 = vmatprep.mubr.bf16.mxu1 %v939_v34 }
 0x209   :  { %1442 = vmatmul.mubr.bf16.vlgmr.msra.gmra.mrb[24].mxu1 %v940_v32 }
 0x20e   :  { %v1423_v35 = vpop.f32.mrb[36].mxu0 }
 0x20f   :  { %v925_v37 = vadd.f32 %v1423_v35, %v1185_v17  ;;  %v916_v20 = vpop.f32.mrb[37].mxu0 }
 0x210   :  { %v917_v38 = vadd.f32 %v1185_v17, %v916_v20  ;;  %v1424_v39 = vpop.f32.mrb[38].mxu0 }
 0x211   :  { %v928_v40 = vadd.f32 %v1424_v39, %v1185_v17  ;;  %v919_v41 = vpop.f32.mrb[39].mxu0  ;;  %v937_v43 = vmax.f32 %v925_v37, 0.0 }
 0x212   :  { %v920_v42 = vadd.f32 %v1185_v17, %v919_v41  ;;  %v935_v45 = vmax.f32 %v917_v38, 0.0 }
 0x213   :  { %v938_v44 = vmax.f32 %v928_v40, 0.0 }
 0x214   :  { %v936_v46 = vmax.f32 %v920_v42, 0.0 }
 0x215   :  { %v942_v47 = vpack.c.bf16 %v938_v44, %v937_v43 }
 0x216   :  { %v941_v48 = vpack.c.bf16 %v936_v46, %v935_v45 }
 0x218   :  { %1445 = vmatprep.mubr.bf16.mxu1 %v941_v48 }
 0x219   :  { %1446 = vmatmul.mubr.bf16.gmra.mrb[28].mxu1 %v942_v47 }
 0x2dc   :  { %v1443_v50 = vpop.f32.mrb[24].mxu1 }
 0x2dd   :  { %v1057_v51 = vadd.f32 %v1443_v50, %v1194_v33  ;;  %v1048_v36 = vpop.f32.mrb[25].mxu1 }
 0x2de   :  { %v1049_v53 = vadd.f32 %v1194_v33, %v1048_v36  ;;  %v1444_v54 = vpop.f32.mrb[26].mxu1 }
 0x2df   :  { %v1060_v55 = vadd.f32 %v1444_v54, %v1194_v33  ;;  %v1051_v56 = vpop.f32.mrb[27].mxu1  ;;  %v1081_v58 = vmax.f32 %v1057_v51, 0.0 }
 0x2e0   :  { %v1052_v57 = vadd.f32 %v1194_v33, %v1051_v56  ;;  %v1079_v60 = vmax.f32 %v1049_v53, 0.0 }
 0x2e1   :  { %v1082_v59 = vmax.f32 %v1060_v55, 0.0 }
 0x2e2   :  { %v1080_v61 = vmax.f32 %v1052_v57, 0.0 }
 0x2e3   :  { %v1227_v62 = vpack.c.bf16 %v1082_v59, %v1081_v58 }
 0x2e4   :  { %v1222_v63 = vpack.c.bf16 %v1080_v61, %v1079_v60 }
 0x2e5   :  { %1239 = vst [vmem:[%s1949_s7 + $0x8] sm:$0xff] %v1227_v62  }
 0x2e6   :  { %1223 = vst [vmem:[%s1949_s7] sm:$0xff] %v1222_v63  }
 0x2ec   :  { %v1447_v49 = vpop.f32.mrb[28].mxu1 }
 0x2ed   :  { %v1073_v0 = vadd.f32 %v1447_v49, %v1194_v33  ;;  %v1064_v2 = vpop.f32.mrb[29].mxu1 }
 0x2ee   :  { %v1065_v3 = vadd.f32 %v1194_v33, %v1064_v2  ;;  %v1448_v52 = vpop.f32.mrb[30].mxu1 }
 0x2ef   :  { %v1076_v5 = vadd.f32 %v1448_v52, %v1194_v33  ;;  %v1067_v6 = vpop.f32.mrb[31].mxu1  ;;  %v1085_v8 = vmax.f32 %v1073_v0, 0.0 }
 0x2f0   :  { %v1068_v7 = vadd.f32 %v1194_v33, %v1067_v6  ;;  %v1083_v10 = vmax.f32 %v1065_v3, 0.0 }
 0x2f1   :  { %v1086_v9 = vmax.f32 %v1076_v5, 0.0 }
 0x2f2   :  { %v1084_v11 = vmax.f32 %v1068_v7, 0.0 }
 0x2f3   :  { %v1237_v12 = vpack.c.bf16 %v1086_v9, %v1085_v8 }
 0x2f4   :  { %v1232_v13 = vpack.c.bf16 %v1084_v11, %v1083_v10 }
 0x2f5   :  { %1241 = vst [vmem:[%s1949_s7 + $0x18] sm:$0xff] %v1237_v12  }
 0x2f6   :  { %1240 = vst [vmem:[%s1949_s7 + $0x10] sm:$0xff] %v1232_v13  }

</bundles_post_ra>
